<compile_context>
chip_gen: v7x
topology: tpu7x:2x2x1
jax: 0.10.0
libtpu: 0.0.40
codegen_flags: <defaults>
</compile_context>

<pallas_src>
import math

import jax
import jax.numpy as jnp
from jax.experimental import pallas as pl
from jax.experimental.pallas import tpu as pltpu


LAYER_SIZES = [128, 256, 128, 64, 32]
OUTPUT_SIZE = 1
LANE = 128      # vreg lane width
TK_MAX = 4096   # max layer-0 K slab (HBM-bound layer: fewest, biggest DMAs)


def _round_up(x, m):
    return ((x + m - 1) // m) * m


def _cdiv(a, b):
    return -(-a // b)


# -----------------------------------------------------------------------------
# Kernel bodies
# -----------------------------------------------------------------------------
def _tail(h0, b0, w1, b1, w2, b2, w3, b3, w4, b4, w5t, b5):
    """Finish layer 0 (bias + ReLU) and run layers 1..5.  MXU matmuls take bf16
    operands with f32 accumulation; bias/ReLU stay f32 on the VPU.  The final
    32->1 layer is a broadcast-mul + lane reduce so only one real f32 output
    column is produced (no padded-output write amplification)."""
    def dense_relu(h, w_ref, b_ref):
        y = jnp.dot(h.astype(jnp.bfloat16), w_ref[...],
                    preferred_element_type=jnp.float32) + b_ref[...]
        return jnp.maximum(y, 0.0)

    h = jnp.maximum(h0 + b0[...], 0.0)   # layer 0: bias + ReLU (f32)
    h = dense_relu(h, w1, b1)            # 128 -> 256
    h = dense_relu(h, w2, b2)            # 256 -> 128
    h = dense_relu(h, w3, b3)            # 128 -> 64  (lane-padded to 128)
    h = dense_relu(h, w4, b4)            # 64  -> 32  (lane-padded to 128)
    # Layer 5: 32 -> 1.  w5t is the transposed weight row (1, 128), f32.
    return jnp.sum(h * w5t[...], axis=-1, keepdims=True) + b5[...]


def _critic_kernel_single_k(x_ref, w0, b0, w1, b1, w2, b2, w3, b3, w4, b4,
                            w5t, b5, o_ref):
    """F fits in one K slab: no accumulator scratch, no zero/RMW pass."""
    h0 = jnp.dot(x_ref[...].astype(jnp.bfloat16), w0[...],
                 preferred_element_type=jnp.float32)
    o_ref[...] = _tail(h0, b0, w1, b1, w2, b2, w3, b3, w4, b4, w5t, b5)


def _critic_kernel_multi_k(x_ref, w0, b0, w1, b1, w2, b2, w3, b3, w4, b4,
                           w5t, b5, o_ref, acc_ref):
    """Layer 0 K-tiled over the 'arbitrary' grid axis with an f32 VMEM
    accumulator; the tiny tail layers run once on the last K step."""
    k = pl.program_id(1)

    @pl.when(k == 0)
    def _():
        acc_ref[...] = jnp.zeros_like(acc_ref)

    acc_ref[...] += jnp.dot(x_ref[...].astype(jnp.bfloat16), w0[...],
                            preferred_element_type=jnp.float32)

    @pl.when(k == pl.num_programs(1) - 1)
    def _():
        o_ref[...] = _tail(acc_ref[...], b0, w1, b1, w2, b2, w3, b3, w4, b4,
                           w5t, b5)


# -----------------------------------------------------------------------------
# Parameter init (matches nn.Linear default: uniform +-1/sqrt(fan_in)),
# stored as logical [in, out] f32 so y = x @ W + b.
# -----------------------------------------------------------------------------
def init_critic_params(key, input_size,
                       layers_sizes=LAYER_SIZES, output_size=OUTPUT_SIZE):
    dims = [input_size] + list(layers_sizes) + [output_size]
    params = []
    for i in range(len(dims) - 1):
        fan_in, fan_out = dims[i], dims[i + 1]
        key, kw, kb = jax.random.split(key, 3)
        bound = 1.0 / math.sqrt(fan_in)
        w = jax.random.uniform(kw, (fan_in, fan_out), jnp.float32, -bound, bound)
        b = jax.random.uniform(kb, (1, fan_out), jnp.float32, -bound, bound)
        params.append((w, b))
    return params


def _pack_params(params, f_pad):
    """Lane-pad hidden-layer weights/biases (weights -> bf16, biases f32).  The
    final [32, 1] layer is stored transposed as an f32 (1, 128) row plus a
    (1, 1) f32 bias so the kernel can lane-reduce it."""
    assert params[-1][0].shape[1] == OUTPUT_SIZE == 1, \
        "lane-reduce tail assumes output_size == 1"
    packed = []
    last = len(params) - 1
    for idx, (w, b) in enumerate(params):
        in_dim, out_dim = w.shape
        in_pad = f_pad if idx == 0 else _round_up(in_dim, LANE)
        if idx == last:
            w_t = jnp.pad(w, ((0, in_pad - in_dim), (0, 0))).T
            packed.append((w_t.astype(jnp.float32),
                           jnp.reshape(b, (1, 1)).astype(jnp.float32)))
        else:
            out_pad = _round_up(out_dim, LANE)
            w_p = jnp.pad(w, ((0, in_pad - in_dim), (0, out_pad - out_dim)))
            b_p = jnp.pad(jnp.reshape(b, (1, out_dim)),
                          ((0, 0), (0, out_pad - out_dim)))
            packed.append((w_p.astype(jnp.bfloat16), b_p.astype(jnp.float32)))
    return packed


# -----------------------------------------------------------------------------
# Wrapper
# -----------------------------------------------------------------------------
def critic_forward(x, params, *, batch_tile=None):
    """x: any shape with leading batch dim; flattened to [B, F] like nn.Flatten().
    Returns a [B, 1] f32 value prediction."""
    B = x.shape[0]
    x2d = jnp.reshape(x, (B, -1))
    if x2d.dtype != jnp.bfloat16:
        x2d = x2d.astype(jnp.float32)   # mirrors torch .float(); bf16 stays bf16
    F = x2d.shape[1]

    # ---- batch tiling --------------------------------------------------------
    # Multiple of 16 rows (bf16-safe sublane packing).  Cap at 128: v5e's MXU
    # gains nothing from 256 and the widest tail activation ((TM, 256) f32)
    # stays register-resident.  Split batches > 16 into >= 2 tiles so the
    # "parallel" batch axis can shard across v7x's two TensorCores.
    if batch_tile is not None:
        TM = _round_up(max(batch_tile, 16), 16)       # validated tile override
    elif B >= 256:
        TM = 128
    elif B > 16:
        TM = min(128, _round_up(_cdiv(B, 2), 16))
    else:
        TM = 16
    B_pad = _round_up(B, TM)

    # ---- layer-0 K tiling ----------------------------------------------------
    # One lane-padded slab when F fits, otherwise the fewest (<= TK_MAX)-wide
    # slabs.  Worst case (TM=128, TK=4096, f32 x) uses ~7 MiB of VMEM including
    # double buffers -- well inside every generation's scoped default (v7x incl.)
    F_lane = _round_up(F, LANE)
    n_k = _cdiv(F_lane, TK_MAX)
    TK = _round_up(_cdiv(F_lane, n_k), LANE)
    F_pad = TK * n_k

    if (B_pad, F_pad) != (B, F):          # skip the pad pass when tile-aligned
        x2d = jnp.pad(x2d, ((0, B_pad - B), (0, F_pad - F)))

    packed = _pack_params(params, F_pad)
    args = [x2d]
    for w, b in packed:
        args.extend([w, b])

    # ---- grid / BlockSpecs ---------------------------------------------------
    if n_k == 1:
        kernel = _critic_kernel_single_k
        grid = (B_pad // TM,)
        const = lambda i: (0, 0)
        in_specs = [pl.BlockSpec((TM, F_pad), lambda i: (i, 0)),    # x
                    pl.BlockSpec((F_pad, LANE), const)]             # w0
        out_specs = pl.BlockSpec((TM, OUTPUT_SIZE), lambda i: (i, 0))
        scratch = []
        dim_sems = ("parallel",)
    else:
        kernel = _critic_kernel_multi_k
        grid = (B_pad // TM, n_k)
        const = lambda i, k: (0, 0)
        in_specs = [pl.BlockSpec((TM, TK), lambda i, k: (i, k)),    # x (K-tiled)
                    pl.BlockSpec((TK, LANE), lambda i, k: (k, 0))]  # w0 (K-tiled)
        out_specs = pl.BlockSpec((TM, OUTPUT_SIZE), lambda i, k: (i, 0))
        scratch = [pltpu.VMEM((TM, LANE), jnp.float32)]             # layer-0 acc
        dim_sems = ("parallel", "arbitrary")

    in_specs.append(pl.BlockSpec(packed[0][1].shape, const))        # b0
    for w, b in packed[1:]:                                         # VMEM-resident tail
        in_specs.append(pl.BlockSpec(w.shape, const))
        in_specs.append(pl.BlockSpec(b.shape, const))

    # ---- cost estimate (padded problem) ----------------------------------------
    dims = [F_pad, LANE, 256, LANE, LANE, LANE, OUTPUT_SIZE]
    flops = 2 * B_pad * sum(dims[i] * dims[i + 1] for i in range(len(dims) - 1))
    bytes_accessed = (x2d.size * x2d.dtype.itemsize
                      + B_pad * OUTPUT_SIZE * 4
                      + sum(w.size * w.dtype.itemsize + b.size * 4
                            for w, b in packed))
    cost = pl.CostEstimate(flops=flops, transcendentals=0,
                           bytes_accessed=bytes_accessed)

    out = pl.pallas_call(
        kernel,
        out_shape=jax.ShapeDtypeStruct((B_pad, OUTPUT_SIZE), jnp.float32),
        grid_spec=pltpu.PrefetchScalarGridSpec(
            num_scalar_prefetch=0,
            grid=grid,
            in_specs=in_specs,
            out_specs=out_specs,
            scratch_shapes=scratch,
        ),
        compiler_params=pltpu.CompilerParams(dimension_semantics=dim_sems),
        cost_estimate=cost,
    )(*args)

    return out[:B]   # drop batch padding; output is already exactly 1 column


# -----------------------------------------------------------------------------
# Pure-JAX reference (f32 throughout)
# -----------------------------------------------------------------------------
def _reference_forward(x, params):
    B = x.shape[0]
    h = jnp.reshape(x, (B, -1)).astype(jnp.float32)
    n = len(params)
    for i, (w, b) in enumerate(params):
        h = h @ w + b
        if i < n - 1:
            h = jnp.maximum(h, 0.0)
    return h


if __name__ == "__main__":
    key = jax.random.PRNGKey(0)
    k_in, k_param, k_in2, k_param2 = jax.random.split(key, 4)

    # --- small state input: batch=2, state (4, 8) -> 32 flattened features ----
    # NOTE: at batch=2 the call is launch/DMA-latency bound; the kernel is sized
    # for training-scale batches where layers 0/1 become MXU/HBM-bound.
    batch, state_shape = 2, (4, 8)
    input_size = math.prod(state_shape)
    x = jax.random.normal(k_in, (batch,) + state_shape, dtype=jnp.float32)
    params = init_critic_params(k_param, input_size)

    out = jax.block_until_ready(critic_forward(x, params))
    ref = _reference_forward(x, params)
    assert out.shape == (batch, OUTPUT_SIZE)
    # bf16 MXU operands (f32 accumulation) -> relaxed tolerance vs f32 reference.
    assert jnp.allclose(out, ref, atol=3e-2, rtol=3e-2), (out, ref)

    # --- larger input exercising the K-tiled + multi-batch-tile path ----------
    batch2, feat2 = 32, 5000
    x2 = jax.random.normal(k_in2, (batch2, feat2), dtype=jnp.float32)
    params2 = init_critic_params(k_param2, feat2)
    out2 = jax.block_until_ready(critic_forward(x2, params2))
    ref2 = _reference_forward(x2, params2)
    assert out2.shape == (batch2, OUTPUT_SIZE)
    assert jnp.allclose(out2, ref2, atol=5e-2, rtol=5e-2), \
        float(jnp.max(jnp.abs(out2 - ref2)))

    print("KERNEL_OK")
</pallas_src>

<mosaic_0001>
module attributes {stable_mosaic.version = 11 : i64} {
  func.func @_critic_kernel_single_k(%arg0: i32, %arg1: memref<16x128xf32, #tpu.memory_space<vmem>>, %arg2: memref<128x128xbf16, #tpu.memory_space<vmem>>, %arg3: memref<1x128xf32, #tpu.memory_space<vmem>>, %arg4: memref<128x256xbf16, #tpu.memory_space<vmem>>, %arg5: memref<1x256xf32, #tpu.memory_space<vmem>>, %arg6: memref<256x128xbf16, #tpu.memory_space<vmem>>, %arg7: memref<1x128xf32, #tpu.memory_space<vmem>>, %arg8: memref<128x128xbf16, #tpu.memory_space<vmem>>, %arg9: memref<1x128xf32, #tpu.memory_space<vmem>>, %arg10: memref<128x128xbf16, #tpu.memory_space<vmem>>, %arg11: memref<1x128xf32, #tpu.memory_space<vmem>>, %arg12: memref<1x128xf32, #tpu.memory_space<vmem>>, %arg13: memref<1x1xf32, #tpu.memory_space<vmem>>, %arg14: memref<16x1xf32, #tpu.memory_space<vmem>>) attributes {dimension_semantics = [#tpu.dimension_semantics<parallel>], iteration_bounds = array<i64: 1>, scalar_prefetch = 0 : i64, scratch_operands = 0 : i64, tpu.core_type = #tpu.core_type<tc>, window_params = [{transform_indices = @transform_0, window_bounds = array<i64: 16, 128>}, {pipeline_mode = #tpu.pipeline_mode<synchronous>, transform_indices = @transform_1, window_bounds = array<i64: 128, 128>}, {pipeline_mode = #tpu.pipeline_mode<synchronous>, transform_indices = @transform_2, window_bounds = array<i64: 1, 128>}, {pipeline_mode = #tpu.pipeline_mode<synchronous>, transform_indices = @transform_3, window_bounds = array<i64: 128, 256>}, {pipeline_mode = #tpu.pipeline_mode<synchronous>, transform_indices = @transform_4, window_bounds = array<i64: 1, 256>}, {pipeline_mode = #tpu.pipeline_mode<synchronous>, transform_indices = @transform_5, window_bounds = array<i64: 256, 128>}, {pipeline_mode = #tpu.pipeline_mode<synchronous>, transform_indices = @transform_6, window_bounds = array<i64: 1, 128>}, {pipeline_mode = #tpu.pipeline_mode<synchronous>, transform_indices = @transform_7, window_bounds = array<i64: 128, 128>}, {pipeline_mode = #tpu.pipeline_mode<synchronous>, transform_indices = @transform_8, window_bounds = array<i64: 1, 128>}, {pipeline_mode = #tpu.pipeline_mode<synchronous>, transform_indices = @transform_9, window_bounds = array<i64: 128, 128>}, {pipeline_mode = #tpu.pipeline_mode<synchronous>, transform_indices = @transform_10, window_bounds = array<i64: 1, 128>}, {pipeline_mode = #tpu.pipeline_mode<synchronous>, transform_indices = @transform_11, window_bounds = array<i64: 1, 128>}, {pipeline_mode = #tpu.pipeline_mode<synchronous>, transform_indices = @transform_12, window_bounds = array<i64: 1, 1>}, {transform_indices = @transform_13, window_bounds = array<i64: 16, 1>}]} {
    %c0 = arith.constant 0 : index
    %c0_0 = arith.constant 0 : index
    %0 = vector.load %arg1[%c0, %c0_0] : memref<16x128xf32, #tpu.memory_space<vmem>>, vector<16x128xf32>
    %1 = arith.truncf %0 : vector<16x128xf32> to vector<16x128xbf16>
    %c0_1 = arith.constant 0 : index
    %c0_2 = arith.constant 0 : index
    %2 = vector.load %arg2[%c0_1, %c0_2] : memref<128x128xbf16, #tpu.memory_space<vmem>>, vector<128x128xbf16>
    %cst = arith.constant dense<0.000000e+00> : vector<16x128xf32>
    %3 = tpu.matmul %1, %2, %cst {dimension_numbers = #tpu.dot_dimension_numbers<[1], [0], [0], [1], [0, 0, 1, 1], [], []>} : vector<16x128xbf16>, vector<128x128xbf16>, vector<16x128xf32> -> vector<16x128xf32>
    %c0_3 = arith.constant 0 : index
    %c0_4 = arith.constant 0 : index
    %4 = vector.load %arg3[%c0_3, %c0_4] : memref<1x128xf32, #tpu.memory_space<vmem>>, vector<1x128xf32>
    %5 = vector.broadcast %4 : vector<1x128xf32> to vector<16x128xf32>
    %6 = arith.addf %3, %5 : vector<16x128xf32>
    %cst_5 = arith.constant 0.000000e+00 : f32
    %7 = vector.broadcast %cst_5 : f32 to vector<16x128xf32>
    %8 = arith.maximumf %6, %7 : vector<16x128xf32>
    %9 = arith.truncf %8 : vector<16x128xf32> to vector<16x128xbf16>
    %c0_6 = arith.constant 0 : index
    %c0_7 = arith.constant 0 : index
    %10 = vector.load %arg4[%c0_6, %c0_7] : memref<128x256xbf16, #tpu.memory_space<vmem>>, vector<128x256xbf16>
    %cst_8 = arith.constant dense<0.000000e+00> : vector<16x256xf32>
    %11 = tpu.matmul %9, %10, %cst_8 {dimension_numbers = #tpu.dot_dimension_numbers<[1], [0], [0], [1], [0, 0, 1, 1], [], []>} : vector<16x128xbf16>, vector<128x256xbf16>, vector<16x256xf32> -> vector<16x256xf32>
    %c0_9 = arith.constant 0 : index
    %c0_10 = arith.constant 0 : index
    %12 = vector.load %arg5[%c0_9, %c0_10] : memref<1x256xf32, #tpu.memory_space<vmem>>, vector<1x256xf32>
    %13 = vector.broadcast %12 : vector<1x256xf32> to vector<16x256xf32>
    %14 = arith.addf %11, %13 : vector<16x256xf32>
    %cst_11 = arith.constant 0.000000e+00 : f32
    %15 = vector.broadcast %cst_11 : f32 to vector<16x256xf32>
    %16 = arith.maximumf %14, %15 : vector<16x256xf32>
    %17 = arith.truncf %16 : vector<16x256xf32> to vector<16x256xbf16>
    %c0_12 = arith.constant 0 : index
    %c0_13 = arith.constant 0 : index
    %18 = vector.load %arg6[%c0_12, %c0_13] : memref<256x128xbf16, #tpu.memory_space<vmem>>, vector<256x128xbf16>
    %cst_14 = arith.constant dense<0.000000e+00> : vector<16x128xf32>
    %19 = tpu.matmul %17, %18, %cst_14 {dimension_numbers = #tpu.dot_dimension_numbers<[1], [0], [0], [1], [0, 0, 1, 1], [], []>} : vector<16x256xbf16>, vector<256x128xbf16>, vector<16x128xf32> -> vector<16x128xf32>
    %c0_15 = arith.constant 0 : index
    %c0_16 = arith.constant 0 : index
    %20 = vector.load %arg7[%c0_15, %c0_16] : memref<1x128xf32, #tpu.memory_space<vmem>>, vector<1x128xf32>
    %21 = vector.broadcast %20 : vector<1x128xf32> to vector<16x128xf32>
    %22 = arith.addf %19, %21 : vector<16x128xf32>
    %cst_17 = arith.constant 0.000000e+00 : f32
    %23 = vector.broadcast %cst_17 : f32 to vector<16x128xf32>
    %24 = arith.maximumf %22, %23 : vector<16x128xf32>
    %25 = arith.truncf %24 : vector<16x128xf32> to vector<16x128xbf16>
    %c0_18 = arith.constant 0 : index
    %c0_19 = arith.constant 0 : index
    %26 = vector.load %arg8[%c0_18, %c0_19] : memref<128x128xbf16, #tpu.memory_space<vmem>>, vector<128x128xbf16>
    %cst_20 = arith.constant dense<0.000000e+00> : vector<16x128xf32>
    %27 = tpu.matmul %25, %26, %cst_20 {dimension_numbers = #tpu.dot_dimension_numbers<[1], [0], [0], [1], [0, 0, 1, 1], [], []>} : vector<16x128xbf16>, vector<128x128xbf16>, vector<16x128xf32> -> vector<16x128xf32>
    %c0_21 = arith.constant 0 : index
    %c0_22 = arith.constant 0 : index
    %28 = vector.load %arg9[%c0_21, %c0_22] : memref<1x128xf32, #tpu.memory_space<vmem>>, vector<1x128xf32>
    %29 = vector.broadcast %28 : vector<1x128xf32> to vector<16x128xf32>
    %30 = arith.addf %27, %29 : vector<16x128xf32>
    %cst_23 = arith.constant 0.000000e+00 : f32
    %31 = vector.broadcast %cst_23 : f32 to vector<16x128xf32>
    %32 = arith.maximumf %30, %31 : vector<16x128xf32>
    %33 = arith.truncf %32 : vector<16x128xf32> to vector<16x128xbf16>
    %c0_24 = arith.constant 0 : index
    %c0_25 = arith.constant 0 : index
    %34 = vector.load %arg10[%c0_24, %c0_25] : memref<128x128xbf16, #tpu.memory_space<vmem>>, vector<128x128xbf16>
    %cst_26 = arith.constant dense<0.000000e+00> : vector<16x128xf32>
    %35 = tpu.matmul %33, %34, %cst_26 {dimension_numbers = #tpu.dot_dimension_numbers<[1], [0], [0], [1], [0, 0, 1, 1], [], []>} : vector<16x128xbf16>, vector<128x128xbf16>, vector<16x128xf32> -> vector<16x128xf32>
    %c0_27 = arith.constant 0 : index
    %c0_28 = arith.constant 0 : index
    %36 = vector.load %arg11[%c0_27, %c0_28] : memref<1x128xf32, #tpu.memory_space<vmem>>, vector<1x128xf32>
    %37 = vector.broadcast %36 : vector<1x128xf32> to vector<16x128xf32>
    %38 = arith.addf %35, %37 : vector<16x128xf32>
    %cst_29 = arith.constant 0.000000e+00 : f32
    %39 = vector.broadcast %cst_29 : f32 to vector<16x128xf32>
    %40 = arith.maximumf %38, %39 : vector<16x128xf32>
    %c0_30 = arith.constant 0 : index
    %c0_31 = arith.constant 0 : index
    %41 = vector.load %arg12[%c0_30, %c0_31] : memref<1x128xf32, #tpu.memory_space<vmem>>, vector<1x128xf32>
    %42 = vector.broadcast %41 : vector<1x128xf32> to vector<16x128xf32>
    %43 = arith.mulf %40, %42 : vector<16x128xf32>
    %cst_32 = arith.constant dense<0.000000e+00> : vector<16xf32>
    %44 = vector.multi_reduction <add>, %43, %cst_32 [1] : vector<16x128xf32> to vector<16xf32>
    %45 = vector.shape_cast %44 : vector<16xf32> to vector<16x1xf32>
    %c0_33 = arith.constant 0 : index
    %c0_34 = arith.constant 0 : index
    %46 = vector.load %arg13[%c0_33, %c0_34] : memref<1x1xf32, #tpu.memory_space<vmem>>, vector<1x1xf32>
    %47 = vector.broadcast %46 : vector<1x1xf32> to vector<16x1xf32>
    %48 = arith.addf %45, %47 : vector<16x1xf32>
    %c0_35 = arith.constant 0 : index
    %c0_36 = arith.constant 0 : index
    %49 = vector.load %arg14[%c0_35, %c0_36] : memref<16x1xf32, #tpu.memory_space<vmem>>, vector<16x1xf32>
    tpu.vector_store %arg14[%c0_35, %c0_36], %48 {strides = array<i32>} : memref<16x1xf32, #tpu.memory_space<vmem>>, vector<16x1xf32>,
    return
  }
  func.func @transform_0(%arg0: i32) -> (i32, i32) {
    %c0_i32 = arith.constant 0 : i32
    %c0_i32_0 = arith.constant 0 : i32
    return %arg0, %c0_i32 : i32, i32
  }
  func.func @transform_1(%arg0: i32) -> (i32, i32) {
    %c0_i32 = arith.constant 0 : i32
    %c0_i32_0 = arith.constant 0 : i32
    %c0_i32_1 = arith.constant 0 : i32
    return %c0_i32, %c0_i32_0 : i32, i32
  }
  func.func @transform_2(%arg0: i32) -> (i32, i32) {
    %c0_i32 = arith.constant 0 : i32
    %c0_i32_0 = arith.constant 0 : i32
    %c0_i32_1 = arith.constant 0 : i32
    return %c0_i32, %c0_i32_0 : i32, i32
  }
  func.func @transform_3(%arg0: i32) -> (i32, i32) {
    %c0_i32 = arith.constant 0 : i32
    %c0_i32_0 = arith.constant 0 : i32
    %c0_i32_1 = arith.constant 0 : i32
    return %c0_i32, %c0_i32_0 : i32, i32
  }
  func.func @transform_4(%arg0: i32) -> (i32, i32) {
    %c0_i32 = arith.constant 0 : i32
    %c0_i32_0 = arith.constant 0 : i32
    %c0_i32_1 = arith.constant 0 : i32
    return %c0_i32, %c0_i32_0 : i32, i32
  }
  func.func @transform_5(%arg0: i32) -> (i32, i32) {
    %c0_i32 = arith.constant 0 : i32
    %c0_i32_0 = arith.constant 0 : i32
    %c0_i32_1 = arith.constant 0 : i32
    return %c0_i32, %c0_i32_0 : i32, i32
  }
  func.func @transform_6(%arg0: i32) -> (i32, i32) {
    %c0_i32 = arith.constant 0 : i32
    %c0_i32_0 = arith.constant 0 : i32
    %c0_i32_1 = arith.constant 0 : i32
    return %c0_i32, %c0_i32_0 : i32, i32
  }
  func.func @transform_7(%arg0: i32) -> (i32, i32) {
    %c0_i32 = arith.constant 0 : i32
    %c0_i32_0 = arith.constant 0 : i32
    %c0_i32_1 = arith.constant 0 : i32
    return %c0_i32, %c0_i32_0 : i32, i32
  }
  func.func @transform_8(%arg0: i32) -> (i32, i32) {
    %c0_i32 = arith.constant 0 : i32
    %c0_i32_0 = arith.constant 0 : i32
    %c0_i32_1 = arith.constant 0 : i32
    return %c0_i32, %c0_i32_0 : i32, i32
  }
  func.func @transform_9(%arg0: i32) -> (i32, i32) {
    %c0_i32 = arith.constant 0 : i32
    %c0_i32_0 = arith.constant 0 : i32
    %c0_i32_1 = arith.constant 0 : i32
    return %c0_i32, %c0_i32_0 : i32, i32
  }
  func.func @transform_10(%arg0: i32) -> (i32, i32) {
    %c0_i32 = arith.constant 0 : i32
    %c0_i32_0 = arith.constant 0 : i32
    %c0_i32_1 = arith.constant 0 : i32
    return %c0_i32, %c0_i32_0 : i32, i32
  }
  func.func @transform_11(%arg0: i32) -> (i32, i32) {
    %c0_i32 = arith.constant 0 : i32
    %c0_i32_0 = arith.constant 0 : i32
    %c0_i32_1 = arith.constant 0 : i32
    return %c0_i32, %c0_i32_0 : i32, i32
  }
  func.func @transform_12(%arg0: i32) -> (i32, i32) {
    %c0_i32 = arith.constant 0 : i32
    %c0_i32_0 = arith.constant 0 : i32
    %c0_i32_1 = arith.constant 0 : i32
    return %c0_i32, %c0_i32_0 : i32, i32
  }
  func.func @transform_13(%arg0: i32) -> (i32, i32) {
    %c0_i32 = arith.constant 0 : i32
    %c0_i32_0 = arith.constant 0 : i32
    return %arg0, %c0_i32 : i32, i32
  }
}

</mosaic_0001>

<bundles_post_ra>
// kernel: tpu_custom_call.1
= control target key start
LH: loop header
LB: loop body
LE: loop exit
PB: predicated region body
PF: predicated region fallthrough
CT: control target
= control target key end

     0   :  { %s1457_s0 = inlined_call_operand.hbm [shape: f32[16,128], index: 0, kind: input, shape index: {}]   ;;  %s1458_s1 = inlined_call_operand.hbm [shape: bf16[128,128], index: 1, kind: input, shape index: {}]   ;;  %s1459_s2 = inlined_call_operand.vmem [shape: f32[1,128], index: 2, kind: input, shape index: {}]   ;;  %s1460_s3 = inlined_call_operand.hbm [shape: bf16[128,256], index: 3, kind: input, shape index: {}]   ;;  %s1461_s4 = inlined_call_operand.vmem [shape: f32[1,256], index: 4, kind: input, shape index: {}]   ;;  %s1462_s5 = inlined_call_operand.hbm [shape: bf16[256,128], index: 5, kind: input, shape index: {}]   ;;  %s1463_s6 = inlined_call_operand.vmem [shape: f32[1,128], index: 6, kind: input, shape index: {}]   ;;  %s1464_s7 = inlined_call_operand.hbm [shape: bf16[128,128], index: 7, kind: input, shape index: {}]   ;;  %s1465_s8 = inlined_call_operand.vmem [shape: f32[1,128], index: 8, kind: input, shape index: {}]   ;;  %s1466_s9 = inlined_call_operand.hbm [shape: bf16[128,128], index: 9, kind: input, shape index: {}]   ;;  %s1467_s10 = inlined_call_operand.vmem [shape: f32[1,128], index: 10, kind: input, shape index: {}]   ;;  %s1468_s11 = inlined_call_operand.vmem [shape: f32[1,128], index: 11, kind: input, shape index: {}]   ;;  %s1469_s12 = inlined_call_operand.<no memory space> [shape: f32[1,1], index: 12, kind: input, shape index: {}]   ;;  %s1470_s13 = inlined_call_operand.vmem [shape: f32[16,1], index: 13, kind: output, shape index: {}]  }
   0x1   :  { %v18_v0 = vstv %s1469_s12 }
   0x2   :  { %19 = vst [vmem:[#allocation2] sm:$0x1] %v18_v0 }
   0x3   :  { %20 = vsyncpa [#allocation4], 0 }
   0x4   :  { %21 = vsyncpa [#allocation6], 0 }
   0x5   :  { %22 = vsyncpa [#allocation9], 0 }
   0x6   :  { %23 = vsyncpa [#allocation12], 0  ;;  %s1233_s27 = smov [#allocation5]   ;;  %s1093_s14 = scalar_lea.hbm %s1458_s1, 1024 }
   0x7   :  { %s41_s28 = sshll.u32 %s1233_s27, 4  ;;  %p1094_p0 = scmp.ne.s32.totalorder %s1458_s1, %s1093_s14  ;;  %s42_s28 = int_to_ptr.vmem [resolvable:$true] %s41_s28 }
   0x8   :  { %p1097_p1 = scmp.lt.u32.totalorder %s1093_s14, %s1458_s1 }
   0xa   :  { %p1099_p2 = pnand %p1097_p1, %p1094_p0 }
   0xc   :  { %1102 = shalt.err (!%p1099_p2)
}
   0xd   :  { %s1103_s12 = scalar_lea.vmem %s42_s28, 1024  ;;  %p1108_p4 = scmp.lt.s32.totalorder %s42_s28, %s42_s28 }
   0xe   :  { %p1104_p3 = scmp.ne.s32.totalorder %s42_s28, %s1103_s12  ;;  %p1109_p5 = scmp.lt.s32.totalorder %s1103_s12, %s1103_s12 }
  0x10   :  { %p1110_p6 = por %p1109_p5, %p1108_p4 }
  0x12   :  { %p1111_p7 = pnand %p1110_p6, %p1104_p3 }
  0x14   :  { %1114 = shalt.err (!%p1111_p7)
}
  0x15   :  { %s1234_s19 = smov 64   ;;  %s1235_s20 = smov 4  }
  0x16   :  { %47 = dma.hbm_to_vmem [thread:$0]  %s1458_s1, 1024, %s42_s28, [#allocation6], %s1234_s19, %s1234_s19, %s1235_s20  }
  0x17   :  { %s1236_s23 = smov [#allocation8]   ;;  %s1237_s25 = smov [#allocation3]  }
  0x18   :  { %s69_s24 = sshll.u32 %s1236_s23, 4  ;;  %s29_s26 = sshll.u32 %s1237_s25, 4  ;;  %s70_s24 = int_to_ptr.vmem [resolvable:$true] %s69_s24  ;;  %s30_s26 = int_to_ptr.vmem [resolvable:$true] %s29_s26 }
  0x19   :  { %s1115_s30 = scalar_lea.hbm %s1462_s5, 2048 }
  0x1a   :  { %p1116_p8 = scmp.ne.s32.totalorder %s1462_s5, %s1115_s30  ;;  %p1119_p9 = scmp.lt.u32.totalorder %s1115_s30, %s1462_s5 }
  0x1c   :  { %p1121_p10 = pnand %p1119_p9, %p1116_p8 }
  0x1e   :  { %1124 = shalt.err (!%p1121_p10)
}
  0x1f   :  { %s1125_s1 = scalar_lea.vmem %s70_s24, 2048  ;;  %p1130_p12 = scmp.lt.s32.totalorder %s70_s24, %s70_s24 }
  0x20   :  { %p1126_p11 = scmp.ne.s32.totalorder %s70_s24, %s1125_s1  ;;  %p1131_p13 = scmp.lt.s32.totalorder %s1125_s1, %s1125_s1 }
  0x22   :  { %p1132_p0 = por %p1131_p13, %p1130_p12 }
  0x24   :  { %p1133_p1 = pnand %p1132_p0, %p1126_p11 }
  0x26   :  { %1136 = shalt.err (!%p1133_p1)
}
  0x27   :  { %75 = dma.hbm_to_vmem [thread:$0]  %s1462_s5, 2048, %s70_s24, [#allocation9], %s1234_s19, %s1234_s19, %s1235_s20  }
  0x28   :  { %s1137_s22 = scalar_lea.hbm %s1457_s0, 256 }
  0x29   :  { %p1138_p2 = scmp.ne.s32.totalorder %s1457_s0, %s1137_s22  ;;  %p1141_p3 = scmp.lt.u32.totalorder %s1137_s22, %s1457_s0 }
  0x2b   :  { %p1143_p4 = pnand %p1141_p3, %p1138_p2 }
  0x2d   :  { %1146 = shalt.err (!%p1143_p4)
}
  0x2e   :  { %s1147_s30 = scalar_lea.vmem %s30_s26, 256  ;;  %p1152_p6 = scmp.lt.s32.totalorder %s30_s26, %s30_s26 }
  0x2f   :  { %p1148_p5 = scmp.ne.s32.totalorder %s30_s26, %s1147_s30  ;;  %p1153_p7 = scmp.lt.s32.totalorder %s1147_s30, %s1147_s30 }
  0x31   :  { %p1154_p8 = por %p1153_p7, %p1152_p6 }
  0x33   :  { %p1155_p9 = pnand %p1154_p8, %p1148_p5 }
  0x35   :  { %1158 = shalt.err (!%p1155_p9)
}
  0x36   :  { %s1238_s5 = smov 128   ;;  %s1239_s24 = smov 8  }
  0x37   :  { %35 = dma.hbm_to_vmem [thread:$0]  %s1457_s0, 256, %s30_s26, [#allocation4], %s1238_s5, %s1238_s5, %s1239_s24  }
  0x38   :  { %s1240_s16 = smov [#allocation7]   ;;  %s1241_s1 = smov [#allocation10]  }
  0x39   :  { %s55_s17 = sshll.u32 %s1240_s16, 4  ;;  %s83_s28 = sshll.u32 %s1241_s1, 4  ;;  %s56_s17 = int_to_ptr.vmem [resolvable:$true] %s55_s17  ;;  %s84_s28 = int_to_ptr.vmem [resolvable:$true] %s83_s28 }
  0x3a   :  { %s1159_s21 = scalar_lea.hbm %s1460_s3, 2048 }
  0x3b   :  { %p1160_p10 = scmp.ne.s32.totalorder %s1460_s3, %s1159_s21  ;;  %p1163_p11 = scmp.lt.u32.totalorder %s1159_s21, %s1460_s3 }
  0x3d   :  { %p1165_p12 = pnand %p1163_p11, %p1160_p10 }
  0x3f   :  { %1168 = shalt.err (!%p1165_p12)
}
  0x40   :  { %s1169_s0 = scalar_lea.vmem %s56_s17, 2048  ;;  %p1174_p0 = scmp.lt.s32.totalorder %s56_s17, %s56_s17 }
  0x41   :  { %p1170_p13 = scmp.ne.s32.totalorder %s56_s17, %s1169_s0  ;;  %p1175_p1 = scmp.lt.s32.totalorder %s1169_s0, %s1169_s0 }
  0x43   :  { %p1176_p2 = por %p1175_p1, %p1174_p0 }
  0x45   :  { %p1177_p3 = pnand %p1176_p2, %p1170_p13 }
  0x47   :  { %1180 = shalt.err (!%p1177_p3)
}
  0x48   :  { %61 = dma.hbm_to_vmem [thread:$0]  %s1460_s3, 2048, %s56_s17, [#allocation6], %s1238_s5, %s1238_s5, %s1239_s24  }
  0x49   :  { %s1181_s15 = scalar_lea.hbm %s1464_s7, 1024 }
  0x4a   :  { %p1182_p4 = scmp.ne.s32.totalorder %s1464_s7, %s1181_s15  ;;  %p1185_p5 = scmp.lt.u32.totalorder %s1181_s15, %s1464_s7 }
  0x4c   :  { %p1187_p6 = pnand %p1185_p5, %p1182_p4 }
  0x4e   :  { %1190 = shalt.err (!%p1187_p6)
}
  0x4f   :  { %s1191_s21 = scalar_lea.vmem %s84_s28, 1024  ;;  %p1196_p8 = scmp.lt.s32.totalorder %s84_s28, %s84_s28 }
  0x50   :  { %p1192_p7 = scmp.ne.s32.totalorder %s84_s28, %s1191_s21  ;;  %p1197_p9 = scmp.lt.s32.totalorder %s1191_s21, %s1191_s21 }
  0x52   :  { %p1198_p10 = por %p1197_p9, %p1196_p8 }
  0x54   :  { %p1199_p11 = pnand %p1198_p10, %p1192_p7 }
  0x56   :  { %1202 = shalt.err (!%p1199_p11)
}
  0x57   :  { %89 = dma.hbm_to_vmem [thread:$0]  %s1464_s7, 1024, %s84_s28, [#allocation9], %s1234_s19, %s1234_s19, %s1235_s20  }
  0x58   :  { %s1242_s24 = smov [#allocation11]   ;;  %s1203_s25 = scalar_lea.hbm %s1466_s9, 1024 }
  0x59   :  { %s97_s17 = sshll.u32 %s1242_s24, 4  ;;  %p1204_p12 = scmp.ne.s32.totalorder %s1466_s9, %s1203_s25  ;;  %s98_s17 = int_to_ptr.vmem [resolvable:$true] %s97_s17 }
  0x5a   :  { %p1207_p13 = scmp.lt.u32.totalorder %s1203_s25, %s1466_s9 }
  0x5c   :  { %p1209_p0 = pnand %p1207_p13, %p1204_p12 }
  0x5e   :  { %1212 = shalt.err (!%p1209_p0)
}
  0x5f   :  { %s1213_s30 = scalar_lea.vmem %s98_s17, 1024  ;;  %p1218_p2 = scmp.lt.s32.totalorder %s98_s17, %s98_s17 }
  0x60   :  { %p1214_p1 = scmp.ne.s32.totalorder %s98_s17, %s1213_s30  ;;  %p1219_p3 = scmp.lt.s32.totalorder %s1213_s30, %s1213_s30 }
  0x62   :  { %p1220_p4 = por %p1219_p3, %p1218_p2 }
  0x64   :  { %p1221_p5 = pnand %p1220_p4, %p1214_p1 }
  0x66   :  { %1224 = shalt.err (!%p1221_p5)
}
  0x67   :  { %103 = dma.hbm_to_vmem [thread:$0]  %s1466_s9, 1024, %s98_s17, [#allocation12], %s1234_s19, %s1234_s19, %s1235_s20  }
  0x68   :  { %1225 = dma.done.wait [#allocation4], 256  }
  0x69   :  { %1226 = vsyncadd [#allocation4], 4294967040 }
  0x6a   :  { %1227 = dma.done.wait [#allocation6], 3072  }
  0x6b   :  { %1228 = vsyncadd [#allocation6], 4294964224 }
  0x6c   :  { %1229 = dma.done.wait [#allocation9], 3072  }
  0x6d   :  { %1230 = vsyncadd [#allocation9], 4294964224 }
  0x6e   :  { %1231 = dma.done.wait [#allocation12], 1024  }
  0x6f   :  { %1232 = vsyncadd [#allocation12], 4294966272  ;;  %v1243_v1 = vmov 0.0   ;;  %vm1244_vm0 = vmmov 0   ;;  %v1029_v2 = vld [vmem:[#allocation5] sm:$0xff]   ;;  %v1030_v3 = vld [vmem:[#allocation5 + $0x8] sm:$0xff]   ;;  %v265_v61 = vlaneseq }
  0x70   :  { %956 = vmatprep.subr.bf16.mxu0 %v1243_v1  ;;  %972 = vmatprep.mubr.msk.bf16.mxu0 %vm1244_vm0, %v1243_v1  ;;  %v1031_v4 = vld [vmem:[#allocation5 + $0x10] sm:$0xff]   ;;  %v1032_v5 = vld [vmem:[#allocation5 + $0x18] sm:$0xff]   ;;  %v1037_v6 = vld [vmem:[#allocation7 + $0x4] ss:$8 sps:$4 sm:$0xff]   ;;  %v1245_v29 = vmov 0   ;;  %vm834_vm1 = vcmask 7168  }
  0x71   :  { %957 = vmatpush3.bf16.msra.mxu0 %v1029_v2  ;;  %v1039_v7 = vld [vmem:[#allocation7] ss:$8 sps:$4 sm:$0xff]   ;;  %v1040_v8 = vld [vmem:[#allocation7 + $0x14] ss:$8 sps:$4 sm:$0xff]   ;;  %355 = vmatprep.subr.bf16.mxu1 %v1037_v6  ;;  %v1042_v9 = vld [vmem:[#allocation7 + $0x10] ss:$8 sps:$4 sm:$0xff]  }
  0x72   :  { %958 = vmatprep.subr.bf16.mxu0 %v1243_v1  ;;  %356 = vmatpush1.bf16.msra.mxu1 %v1039_v7  ;;  %v1043_v10 = vld [vmem:[#allocation7 + $0x24] ss:$8 sps:$4 sm:$0xff]   ;;  %v1045_v13 = vld [vmem:[#allocation7 + $0x20] ss:$8 sps:$4 sm:$0xff]   ;;  %v1046_v14 = vld [vmem:[#allocation7 + $0x34] ss:$8 sps:$4 sm:$0xff]  }
  0x73   :  { %357 = vmatprep.subr.bf16.mxu1 %v1040_v8  ;;  %v1033_v11 = vld [vmem:[#allocation5 + $0x20] sm:$0xff]   ;;  %v1034_v12 = vld [vmem:[#allocation5 + $0x28] sm:$0xff]   ;;  %v1048_v15 = vld [vmem:[#allocation7 + $0x30] ss:$8 sps:$4 sm:$0xff]   ;;  %387 = vmatprep.mubr.bf16.mxu1 %v1245_v29  ;;  %v266_v62 = vshrl.u32 %v265_v61, 7 }
  0x74   :  { %v1049_v16 = vld [vmem:[#allocation7 + $0x44] ss:$8 sps:$4 sm:$0xff]   ;;  %v1035_v17 = vld [vmem:[#allocation5 + $0x30] sm:$0xff]   ;;  %v1051_v18 = vld [vmem:[#allocation7 + $0x40] ss:$8 sps:$4 sm:$0xff]  }
  0x75   :  { %959 = vmatpush3.bf16.msra.mxu0 %v1030_v3  ;;  %v1052_v19 = vld [vmem:[#allocation7 + $0x54] ss:$8 sps:$4 sm:$0xff]   ;;  %v1054_v23 = vld [vmem:[#allocation7 + $0x50] ss:$8 sps:$4 sm:$0xff]   ;;  %v1055_v25 = vld [vmem:[#allocation7 + $0x64] ss:$8 sps:$4 sm:$0xff]  }
  0x76   :  { %960 = vmatprep.subr.bf16.mxu0 %v1243_v1  ;;  %358 = vmatpush1.bf16.msra.mxu1 %v1042_v9  ;;  %v1036_v20 = vld [vmem:[#allocation5 + $0x38] sm:$0xff]   ;;  %v129_v21 = vld [vmem:[#allocation3] sm:$0xff]  ;;  %v1057_v26 = vld [vmem:[#allocation7 + $0x60] ss:$8 sps:$4 sm:$0xff]   ;;  %v267_v63 = vsub.s32 0, %v266_v62  ;;  %v271_v2 = vsub.s32 1, %v266_v62 }
  0x77   :  { %359 = vmatprep.subr.bf16.mxu1 %v1043_v10  ;;  %v130_v22 = vld [vmem:[#allocation3 + $0x8] sm:$0xff]  ;;  %v1061_v30 = vld [vmem:[#allocation8 + $0x40] sm:$0xff]   ;;  %v1063_v32 = vld [vmem:[#allocation8 + $0x48] sm:$0xff]  }
  0x78   :  { %v131_v24 = vpack.c.bf16 %v130_v22, %v129_v21  ;;  %v1058_v27 = vld [vmem:[#allocation7 + $0x74] ss:$8 sps:$4 sm:$0xff]   ;;  %v1060_v28 = vld [vmem:[#allocation7 + $0x70] ss:$8 sps:$4 sm:$0xff]   ;;  %v1062_v31 = vld [vmem:[#allocation8] sm:$0xff]  }
  0x79   :  { %961 = vmatpush3.bf16.msra.mxu0 %v1031_v4  ;;  %v1064_v33 = vld [vmem:[#allocation8 + $0x8] sm:$0xff]   ;;  %v1065_v34 = vld [vmem:[#allocation8 + $0x50] sm:$0xff]   ;;  %v1067_v36 = vld [vmem:[#allocation8 + $0x58] sm:$0xff]  }
  0x7a   :  { %962 = vmatprep.subr.bf16.mxu0 %v1243_v1  ;;  %360 = vmatpush1.bf16.msra.mxu1 %v1045_v13  ;;  %v1066_v35 = vld [vmem:[#allocation8 + $0x10] sm:$0xff]   ;;  %v1068_v37 = vld [vmem:[#allocation8 + $0x18] sm:$0xff]   ;;  %v1069_v38 = vld [vmem:[#allocation8 + $0x60] sm:$0xff]  }
  0x7b   :  { %361 = vmatprep.subr.bf16.mxu1 %v1046_v14  ;;  %v1070_v39 = vld [vmem:[#allocation8 + $0x20] sm:$0xff]   ;;  %v1071_v40 = vld [vmem:[#allocation8 + $0x68] sm:$0xff]   ;;  %v1073_v52 = vld [vmem:[#allocation8 + $0x70] sm:$0xff]  }
  0x7c   :  { %v845_v41 = vld [vmem:[%s1459_s2] ss:$0 sm:$0xff]  ;;  %v1074_v53 = vld [vmem:[#allocation8 + $0x30] sm:$0xff]   ;;  %v1075_v54 = vld [vmem:[#allocation8 + $0x78] sm:$0xff]  }
  0x7d   :  { %963 = vmatpush3.bf16.msra.mxu0 %v1032_v5  ;;  %v1072_v51 = vld [vmem:[#allocation8 + $0x28] sm:$0xff]   ;;  %v1076_v55 = vld [vmem:[#allocation8 + $0x38] sm:$0xff]   ;;  %v1077_v56 = vld [vmem:[#allocation10] sm:$0xff]  }
  0x7e   :  { %964 = vmatprep.subr.bf16.mxu0 %v1243_v1  ;;  %362 = vmatpush1.bf16.msra.mxu1 %v1048_v15  ;;  %v1078_v57 = vld [vmem:[#allocation10 + $0x8] sm:$0xff]   ;;  %v1079_v58 = vld [vmem:[#allocation10 + $0x10] sm:$0xff]   ;;  %v1080_v59 = vld [vmem:[#allocation10 + $0x18] sm:$0xff]  }
  0x7f   :  { %363 = vmatprep.subr.bf16.mxu1 %v1049_v16  ;;  %v1081_v60 = vld [vmem:[#allocation10 + $0x20] sm:$0xff]   ;;  %v263_v0 = vld [vmem:[%s1461_s4] sm:$0x3]  ;;  %v1084_v21 = vld [vmem:[#allocation10 + $0x38] sm:$0xff]  }
  0x80   :  { %v268_v3 = vrot.slane %v263_v0, %v267_v63  ;;  %v272_v4 = vrot.slane %v263_v0, %v271_v2  ;;  %v1085_v22 = vld [vmem:[#allocation11] sm:$0xff]   ;;  %v870_v29 = vld [vmem:[%s1463_s6] ss:$0 sm:$0xff] }
  0x81   :  { %965 = vmatpush3.bf16.msra.mxu0 %v1033_v11  ;;  %v906_v63 = vld [vmem:[#allocation2] ss:$0 sm:$0xff] }
  0x82   :  { %966 = vmatprep.subr.bf16.mxu0 %v1243_v1  ;;  %364 = vmatpush1.bf16.msra.mxu1 %v1051_v18 }
  0x83   :  { %365 = vmatprep.subr.bf16.mxu1 %v1052_v19  ;;  %v1082_v19 = vld [vmem:[#allocation10 + $0x28] sm:$0xff]  }
  0x85   :  { %967 = vmatpush3.bf16.msra.mxu0 %v1034_v12 }
  0x86   :  { %968 = vmatprep.subr.bf16.mxu0 %v1243_v1  ;;  %366 = vmatpush1.bf16.msra.mxu1 %v1054_v23  ;;  %v1086_v23 = vld [vmem:[#allocation11 + $0x8] sm:$0xff]  }
  0x87   :  { %367 = vmatprep.subr.bf16.mxu1 %v1055_v25  ;;  %v1088_v25 = vld [vmem:[#allocation11 + $0x18] sm:$0xff]  }
  0x89   :  { %969 = vmatpush3.bf16.msra.mxu0 %v1035_v17 }
  0x8a   :  { %970 = vmatprep.subr.bf16.mxu0 %v1243_v1  ;;  %368 = vmatpush1.bf16.msra.mxu1 %v1057_v26  ;;  %v1089_v26 = vld [vmem:[#allocation11 + $0x20] sm:$0xff]  }
  0x8b   :  { %369 = vmatprep.subr.bf16.mxu1 %v1058_v27  ;;  %v1090_v27 = vld [vmem:[#allocation11 + $0x28] sm:$0xff]  }
  0x8d   :  { %971 = vmatpush3.bf16.msra.mxu0 %v1036_v20  ;;  %v1083_v20 = vld [vmem:[#allocation10 + $0x30] sm:$0xff]  }
  0x8e   :  { %370 = vmatpush1.bf16.msra.mxu1 %v1060_v28  ;;  %916 = vmatprep.subr.bf16.mxu0 %v1061_v30 }
  0x8f   :  { %976 = vmatprep.subr.bf16.mxu1 %v1243_v1 }
  0x90   :  { %973 = vmatmul.mubr.bf16.vlgmr.msra.gmra.mrb[0].mxu0 %v131_v24  ;;  %v1087_v24 = vld [vmem:[#allocation11 + $0x10] sm:$0xff]  }
  0x91   :  { %917 = vmatpush3.bf16.msra.mxu0 %v1062_v31 }
  0x92   :  { %918 = vmatprep.subr.bf16.mxu0 %v1063_v32 }
  0x95   :  { %919 = vmatpush3.bf16.msra.mxu0 %v1064_v33 }
  0x96   :  { %920 = vmatprep.subr.bf16.mxu0 %v1065_v34 }
  0x99   :  { %921 = vmatpush3.bf16.msra.mxu0 %v1066_v35 }
  0x9a   :  { %922 = vmatprep.subr.bf16.mxu0 %v1067_v36 }
  0x9d   :  { %923 = vmatpush3.bf16.msra.mxu0 %v1068_v37 }
  0x9e   :  { %924 = vmatprep.subr.bf16.mxu0 %v1069_v38 }
  0xa1   :  { %925 = vmatpush3.bf16.msra.mxu0 %v1070_v39 }
  0xa2   :  { %926 = vmatprep.subr.bf16.mxu0 %v1071_v40  ;;  %v1091_v40 = vld [vmem:[#allocation11 + $0x30] sm:$0xff]  }
  0xa5   :  { %927 = vmatpush3.bf16.msra.mxu0 %v1072_v51 }
  0xa6   :  { %928 = vmatprep.subr.bf16.mxu0 %v1073_v52 }
  0xa9   :  { %929 = vmatpush3.bf16.msra.mxu0 %v1074_v53 }
  0xaa   :  { %930 = vmatprep.subr.bf16.mxu0 %v1075_v54 }
  0xad   :  { %931 = vmatpush3.bf16.msra.mxu0 %v1076_v55 }
  0xae   :  { %996 = vmatprep.subr.bf16.mxu0 %v1243_v1 }
 0x163   :  { %v237_v42 = vpop.f32.mrb[0].mxu0 }
 0x164   :  { %v238_v43 = vadd.f32 %v845_v41, %v237_v42  ;;  %v974_v44 = vpop.f32.mrb[1].mxu0  ;;  %v887_v42 = vld [vmem:[%s1465_s8] ss:$0 sm:$0xff] }
 0x165   :  { %v240_v45 = vpop.f32.mrb[2].mxu0 }
 0x166   :  { %v241_v46 = vadd.f32 %v845_v41, %v240_v45  ;;  %v975_v47 = vpop.f32.mrb[3].mxu0  ;;  %v244_v48 = vmax.f32 %v238_v43, 0.0  ;;  %v1092_v41 = vld [vmem:[#allocation11 + $0x38] sm:$0xff]  }
 0x168   :  { %v245_v49 = vmax.f32 %v241_v46, 0.0 }
 0x16a   :  { %v246_v50 = vpack.c.bf16 %v245_v49, %v244_v48 }
 0x16c   :  { %388 = vmatmul.mubr.bf16.vlgmr.msra.gmra.mrb[0].mxu1 %v246_v50 }
 0x16d   :  { %992 = vmatprep.mubr.msk.bf16.mxu1 %vm1244_vm0, %v1243_v1  ;;  %977 = vmatpush3.bf16.msra.mxu1 %v1077_v56  ;;  %v905_v56 = vld [vmem:[%s1468_s11] ss:$0 sm:$0xff] }
 0x16e   :  { %978 = vmatprep.subr.bf16.mxu1 %v1243_v1 }
 0x171   :  { %979 = vmatpush3.bf16.msra.mxu1 %v1078_v57 }
 0x172   :  { %980 = vmatprep.subr.bf16.mxu1 %v1243_v1 }
 0x175   :  { %981 = vmatpush3.bf16.msra.mxu1 %v1079_v58 }
 0x176   :  { %982 = vmatprep.subr.bf16.mxu1 %v1243_v1 }
 0x179   :  { %983 = vmatpush3.bf16.msra.mxu1 %v1080_v59 }
 0x17a   :  { %984 = vmatprep.subr.bf16.mxu1 %v1243_v1 }
 0x17d   :  { %985 = vmatpush3.bf16.msra.mxu1 %v1081_v60 }
 0x17e   :  { %986 = vmatprep.subr.bf16.mxu1 %v1243_v1 }
 0x181   :  { %987 = vmatpush3.bf16.msra.mxu1 %v1082_v19 }
 0x182   :  { %988 = vmatprep.subr.bf16.mxu1 %v1243_v1 }
 0x185   :  { %989 = vmatpush3.bf16.msra.mxu1 %v1083_v20 }
 0x186   :  { %990 = vmatprep.subr.bf16.mxu1 %v1243_v1 }
 0x189   :  { %991 = vmatpush3.bf16.msra.mxu1 %v1084_v21 }
 0x23f   :  { %v389_v5 = vpop.f32.mrb[0].mxu1 }
 0x240   :  { %v390_v6 = vadd.f32 %v389_v5, %v268_v3  ;;  %v391_v7 = vpop.f32.mrb[1].mxu1 }
 0x241   :  { %v392_v8 = vadd.f32 %v391_v7, %v272_v4  ;;  %v393_v9 = vpop.f32.mrb[2].mxu1 }
 0x242   :  { %v394_v10 = vadd.f32 %v393_v9, %v268_v3  ;;  %v395_v11 = vpop.f32.mrb[3].mxu1  ;;  %v398_v13 = vmax.f32 %v390_v6, 0.0 }
 0x243   :  { %v396_v12 = vadd.f32 %v395_v11, %v272_v4  ;;  %v399_v15 = vmax.f32 %v392_v8, 0.0 }
 0x244   :  { %v400_v14 = vmax.f32 %v394_v10, 0.0 }
 0x245   :  { %v401_v16 = vmax.f32 %v396_v12, 0.0 }
 0x246   :  { %v402_v17 = vpack.c.bf16 %v400_v14, %v398_v13 }
 0x247   :  { %v403_v18 = vpack.c.bf16 %v401_v16, %v399_v15 }
 0x249   :  { %571 = vmatprep.mubr.bf16.mxu0 %v403_v18 }
 0x24a   :  { %572 = vmatmul.mubr.bf16.vlgmr.msra.gmra.mrb[4].mxu0 %v402_v17 }
 0x24b   :  { %1012 = vmatprep.mubr.msk.bf16.mxu0 %vm1244_vm0, %v1243_v1  ;;  %997 = vmatpush3.bf16.msra.mxu0 %v1085_v22 }
 0x24c   :  { %998 = vmatprep.subr.bf16.mxu0 %v1243_v1 }
 0x24f   :  { %999 = vmatpush3.bf16.msra.mxu0 %v1086_v23 }
 0x250   :  { %1000 = vmatprep.subr.bf16.mxu0 %v1243_v1 }
 0x253   :  { %1001 = vmatpush3.bf16.msra.mxu0 %v1087_v24 }
 0x254   :  { %1002 = vmatprep.subr.bf16.mxu0 %v1243_v1 }
 0x257   :  { %1003 = vmatpush3.bf16.msra.mxu0 %v1088_v25 }
 0x258   :  { %1004 = vmatprep.subr.bf16.mxu0 %v1243_v1 }
 0x25b   :  { %1005 = vmatpush3.bf16.msra.mxu0 %v1089_v26 }
 0x25c   :  { %1006 = vmatprep.subr.bf16.mxu0 %v1243_v1 }
 0x25f   :  { %1007 = vmatpush3.bf16.msra.mxu0 %v1090_v27 }
 0x260   :  { %1008 = vmatprep.subr.bf16.mxu0 %v1243_v1 }
 0x263   :  { %1009 = vmatpush3.bf16.msra.mxu0 %v1091_v40 }
 0x264   :  { %1010 = vmatprep.subr.bf16.mxu0 %v1243_v1  ;;  %v896_v1 = vld [vmem:[%s1467_s10] ss:$0 sm:$0xff] }
 0x267   :  { %1011 = vmatpush3.bf16.msra.mxu0 %v1092_v41 }
 0x31d   :  { %v932_v28 = vpop.f32.mrb[4].mxu0 }
 0x31e   :  { %v933_v30 = vpop.f32.mrb[5].mxu0 }
 0x31f   :  { %v934_v31 = vadd.f32 %v933_v30, %v932_v28  ;;  %v935_v32 = vpop.f32.mrb[6].mxu0 }
 0x320   :  { %v936_v33 = vpop.f32.mrb[7].mxu0 }
 0x321   :  { %v574_v34 = vadd.f32 %v934_v31, %v870_v29  ;;  %v937_v35 = vadd.f32 %v936_v33, %v935_v32 }
 0x323   :  { %v577_v36 = vadd.f32 %v937_v35, %v870_v29  ;;  %v580_v37 = vmax.f32 %v574_v34, 0.0 }
 0x325   :  { %v581_v38 = vmax.f32 %v577_v36, 0.0 }
 0x327   :  { %v582_v39 = vpack.c.bf16 %v581_v38, %v580_v37 }
 0x329   :  { %993 = vmatmul.mubr.bf16.vlgmr.msra.gmra.mrb[4].mxu1 %v582_v39 }
 0x3fc   :  { %v688_v43 = vpop.f32.mrb[4].mxu1 }
 0x3fd   :  { %v689_v44 = vadd.f32 %v887_v42, %v688_v43  ;;  %v994_v45 = vpop.f32.mrb[5].mxu1 }
 0x3fe   :  { %v691_v46 = vpop.f32.mrb[6].mxu1 }
 0x3ff   :  { %v692_v47 = vadd.f32 %v887_v42, %v691_v46  ;;  %v995_v48 = vpop.f32.mrb[7].mxu1  ;;  %v695_v49 = vmax.f32 %v689_v44, 0.0 }
 0x401   :  { %v696_v50 = vmax.f32 %v692_v47, 0.0 }
 0x403   :  { %v697_v51 = vpack.c.bf16 %v696_v50, %v695_v49 }
 0x405   :  { %1013 = vmatmul.mubr.bf16.vlgmr.msra.gmra.mrb[8].mxu0 %v697_v51 }
 0x4d8   :  { %v803_v52 = vpop.f32.mrb[8].mxu0 }
 0x4d9   :  { %v804_v53 = vadd.f32 %v896_v1, %v803_v52  ;;  %v1014_v54 = vpop.f32.mrb[9].mxu0 }
 0x4da   :  { %v806_v55 = vpop.f32.mrb[10].mxu0 }
 0x4db   :  { %v810_v57 = vmax.f32 %v804_v53, 0.0  ;;  %v807_v58 = vadd.f32 %v896_v1, %v806_v55  ;;  %v1015_v59 = vpop.f32.mrb[11].mxu0 }
 0x4dd   :  { %v811_v60 = vmax.f32 %v807_v58, 0.0  ;;  %v819_v61 = vmul.f32 %v905_v56, %v810_v57 }
 0x4df   :  { %821 = vadd.xlane.f32.xlu0 %v819_v61  ;;  %v820_v62 = vmul.f32 %v905_v56, %v811_v60 }
 0x4e3   :  { %823 = vadd.xlane.f32.xlu0 %v820_v62 }
 0x56c   :  { %v822_v0 = vpop.xlane.xlu0 %821 }
 0x56d   :  { %v832_v2 = vadd.f32 %v906_v63, %v822_v0 }
 0x56f   :  { %835 = vst.msk [vmem:[%s1470_s13] sm:$0xff] %vm834_vm1, %v832_v2 }
 0x570   :  { %v824_v3 = vpop.xlane.xlu0 %823 }
 0x571   :  { %v833_v4 = vadd.f32 %v906_v63, %v824_v3 }
 0x573   :  { %836 = vst.msk [vmem:[%s1470_s13 + $0x8] sm:$0xff] %vm834_vm1, %v833_v4 }
 0x574   :  { %841 = vsyncpa [#allocation4], 1 }
 0x575   :  { %842 = vsyncpa [#allocation6], 1 }
 0x576   :  { %843 = vsyncpa [#allocation9], 1 }
 0x577   :  { %844 = vsyncpa [#allocation12], 1 }

</bundles_post_ra>
